<compile_context>
chip_gen: v7x
topology: tpu7x:2x2x1
jax: 0.10.0
libtpu: 0.0.40
codegen_flags: <defaults>
</compile_context>

<pallas_src>
import jax
import jax.numpy as jnp
from jax.experimental import pallas as pl
from jax.experimental.pallas import tpu as pltpu


def _stats_kernel(x1_ref, x2_ref, w1_ref, w2_ref, sum_ref, ssq_ref):
    # x1_ref: (C1, T), x2_ref: (C2, T), w1_ref: (Cout, C1), w2_ref: (Cout, C2)
    # sum_ref / ssq_ref: (Cout, 1) accumulators, resident in VMEM across the whole grid.
    @pl.when((pl.program_id(0) == 0) & (pl.program_id(1) == 0))
    def _init():
        sum_ref[...] = jnp.zeros_like(sum_ref)
        ssq_ref[...] = jnp.zeros_like(ssq_ref)

    y = (
        jnp.dot(w1_ref[...], x1_ref[...].astype(jnp.float32),
                preferred_element_type=jnp.float32)
        + jnp.dot(w2_ref[...], x2_ref[...].astype(jnp.float32),
                  preferred_element_type=jnp.float32)
    )  # (Cout, T)

    # Single traversal: accumulate sum and sum-of-squares (var derived later).
    sum_ref[...] += jnp.sum(y, axis=1, keepdims=True)
    ssq_ref[...] += jnp.sum(y * y, axis=1, keepdims=True)


def _apply_kernel(x1_ref, x2_ref, w1_ref, w2_ref, scale_ref, shift_ref, alpha_ref, o_ref):
    # Recompute the cheap matmul for this tile, then apply folded BN + PReLU.
    y = (
        jnp.dot(w1_ref[...], x1_ref[...].astype(jnp.float32),
                preferred_element_type=jnp.float32)
        + jnp.dot(w2_ref[...], x2_ref[...].astype(jnp.float32),
                  preferred_element_type=jnp.float32)
    )  # (Cout, T)

    yhat = y * scale_ref[...] + shift_ref[...]          # (Cout,1) broadcast over lanes
    o_ref[...] = jnp.where(yhat >= 0.0, yhat, alpha_ref[...] * yhat).astype(o_ref.dtype)


def _pick_spatial_tile(hw):
    for t in (2048, 1024, 512, 256, 128):
        if hw % t == 0:
            return t
    # TODO(synk): HW not a multiple of 128 falls back to one full-spatial block per image;
    #             masked remainder tiles would be needed for very large ragged HW.
    return hw


def cat_conv2d(x1, x2, w, gamma, beta, alpha, eps=1e-5):
    """x1: (N,C1,H,W), x2: (N,C2,H,W) float32; w: (Cout, C1+C2, 1, 1); gamma/beta/alpha: (Cout,)."""
    N, C1, H, W = x1.shape
    C2 = x2.shape[1]
    Cout = w.shape[0]
    HW = H * W
    T = _pick_spatial_tile(HW)
    nt = HW // T
    grid = (N, nt)

    # Pure reshapes (no data movement): channels stay on sublanes, spatial on lanes.
    x1f = x1.reshape(N, C1, HW)
    x2f = x2.reshape(N, C2, HW)
    w2d = w.reshape(Cout, C1 + C2).astype(jnp.float32)
    w1 = w2d[:, :C1]
    w2 = w2d[:, C1:]

    # ---- phase 1: per-channel sum / sum-of-squares over all N*H*W positions ----
    sums, ssqs = pl.pallas_call(
        _stats_kernel,
        out_shape=(
            jax.ShapeDtypeStruct((Cout, 1), jnp.float32),
            jax.ShapeDtypeStruct((Cout, 1), jnp.float32),
        ),
        grid=grid,
        in_specs=[
            pl.BlockSpec((None, C1, T), lambda n, t: (n, 0, t)),
            pl.BlockSpec((None, C2, T), lambda n, t: (n, 0, t)),
            pl.BlockSpec((Cout, C1), lambda n, t: (0, 0)),
            pl.BlockSpec((Cout, C2), lambda n, t: (0, 0)),
        ],
        out_specs=(
            pl.BlockSpec((Cout, 1), lambda n, t: (0, 0)),
            pl.BlockSpec((Cout, 1), lambda n, t: (0, 0)),
        ),
        compiler_params=pltpu.CompilerParams(
            dimension_semantics=("arbitrary", "arbitrary")),
    )(x1f, x2f, w1, w2)

    # ---- fold BN (training-mode batch stats, biased variance) into scale/shift ----
    m = jnp.float32(N * HW)
    mean = sums / m                                      # (Cout, 1)
    var = jnp.maximum(ssqs / m - mean * mean, 0.0)       # biased variance
    inv = jax.lax.rsqrt(var + eps)
    scale = inv * gamma.reshape(Cout, 1).astype(jnp.float32)
    shift = beta.reshape(Cout, 1).astype(jnp.float32) - mean * scale
    alpha2d = alpha.reshape(Cout, 1).astype(jnp.float32)

    # ---- phase 2: normalize + PReLU, lane-dense NCHW output tiles ----
    out = pl.pallas_call(
        _apply_kernel,
        out_shape=jax.ShapeDtypeStruct((N, Cout, HW), x1.dtype),
        grid=grid,
        in_specs=[
            pl.BlockSpec((None, C1, T), lambda n, t: (n, 0, t)),
            pl.BlockSpec((None, C2, T), lambda n, t: (n, 0, t)),
            pl.BlockSpec((Cout, C1), lambda n, t: (0, 0)),
            pl.BlockSpec((Cout, C2), lambda n, t: (0, 0)),
            pl.BlockSpec((Cout, 1), lambda n, t: (0, 0)),
            pl.BlockSpec((Cout, 1), lambda n, t: (0, 0)),
            pl.BlockSpec((Cout, 1), lambda n, t: (0, 0)),
        ],
        out_specs=pl.BlockSpec((None, Cout, T), lambda n, t: (n, 0, t)),
        compiler_params=pltpu.CompilerParams(
            dimension_semantics=("parallel", "parallel")),
    )(x1f, x2f, w1, w2, scale, shift, alpha2d)

    return out.reshape(N, Cout, H, W)


def _reference(x1, x2, w, gamma, beta, alpha, eps=1e-5):
    x = jnp.concatenate([x1, x2], axis=1)
    Cout, Cin = w.shape[0], x.shape[1]
    y = jnp.einsum("oi,nihw->nohw", w.reshape(Cout, Cin), x)
    mean = y.mean(axis=(0, 2, 3), keepdims=True)
    var = ((y - mean) ** 2).mean(axis=(0, 2, 3), keepdims=True)
    yhat = (y - mean) * jax.lax.rsqrt(var + eps) * gamma.reshape(1, Cout, 1, 1) \
        + beta.reshape(1, Cout, 1, 1)
    a = alpha.reshape(1, Cout, 1, 1)
    return jnp.where(yhat >= 0, yhat, a * yhat)


if __name__ == "__main__":
    key = jax.random.PRNGKey(0)
    k1, k2, kw = jax.random.split(key, 3)

    # Small shapes consistent with CatConv2D(in_channels=8, out_channels=8, kernel=1)
    N, C1, C2, H, W = 2, 4, 4, 16, 16
    Cin = C1 + C2
    Cout = 8

    x1 = jax.random.normal(k1, (N, C1, H, W), jnp.float32)
    x2 = jax.random.normal(k2, (N, C2, H, W), jnp.float32)

    # Deterministic parameter init (mirrors PyTorch defaults in spirit):
    #   conv weight: uniform(-1/sqrt(fan_in), 1/sqrt(fan_in)), fan_in = Cin (kernel=1), bias=False
    #   BatchNorm:   gamma = 1, beta = 0
    #   PReLU:       alpha = 0.25 per channel
    bound = 1.0 / (Cin ** 0.5)
    w = jax.random.uniform(kw, (Cout, Cin, 1, 1), jnp.float32, -bound, bound)
    gamma = jnp.ones((Cout,), jnp.float32)
    beta = jnp.zeros((Cout,), jnp.float32)
    alpha = jnp.full((Cout,), 0.25, jnp.float32)

    out = jax.jit(cat_conv2d)(x1, x2, w, gamma, beta, alpha)
    jax.block_until_ready(out)
    assert out.shape == (N, Cout, H, W)

    ref = _reference(x1, x2, w, gamma, beta, alpha)
    assert float(jnp.max(jnp.abs(out - ref))) < 1e-3

    print("KERNEL_OK")
</pallas_src>

<mosaic_0001>
module attributes {stable_mosaic.version = 11 : i64} {
  func.func @_apply_kernel(%arg0: i32, %arg1: i32, %arg2: memref<1x4x256xf32, #tpu.memory_space<vmem>>, %arg3: memref<1x4x256xf32, #tpu.memory_space<vmem>>, %arg4: memref<8x4xf32, #tpu.memory_space<vmem>>, %arg5: memref<8x4xf32, #tpu.memory_space<vmem>>, %arg6: memref<8x1xf32, #tpu.memory_space<vmem>>, %arg7: memref<8x1xf32, #tpu.memory_space<vmem>>, %arg8: memref<8x1xf32, #tpu.memory_space<vmem>>, %arg9: memref<1x8x256xf32, #tpu.memory_space<vmem>>) attributes {dimension_semantics = [#tpu.dimension_semantics<parallel>, #tpu.dimension_semantics<parallel>], iteration_bounds = array<i64: 2, 1>, scalar_prefetch = 0 : i64, scratch_operands = 0 : i64, tpu.core_type = #tpu.core_type<tc>, window_params = [{transform_indices = @transform_0, window_bounds = array<i64: 1, 4, 256>}, {transform_indices = @transform_1, window_bounds = array<i64: 1, 4, 256>}, {pipeline_mode = #tpu.pipeline_mode<synchronous>, transform_indices = @transform_2, window_bounds = array<i64: 8, 4>}, {pipeline_mode = #tpu.pipeline_mode<synchronous>, transform_indices = @transform_3, window_bounds = array<i64: 8, 4>}, {pipeline_mode = #tpu.pipeline_mode<synchronous>, transform_indices = @transform_4, window_bounds = array<i64: 8, 1>}, {pipeline_mode = #tpu.pipeline_mode<synchronous>, transform_indices = @transform_5, window_bounds = array<i64: 8, 1>}, {pipeline_mode = #tpu.pipeline_mode<synchronous>, transform_indices = @transform_6, window_bounds = array<i64: 8, 1>}, {transform_indices = @transform_7, window_bounds = array<i64: 1, 8, 256>}]} {
    %c0 = arith.constant 0 : index
    %c0_0 = arith.constant 0 : index
    %0 = vector.load %arg4[%c0, %c0_0] : memref<8x4xf32, #tpu.memory_space<vmem>>, vector<8x4xf32>
    %c0_1 = arith.constant 0 : index
    %c0_2 = arith.constant 0 : index
    %c0_3 = arith.constant 0 : index
    %1 = vector.load %arg2[%c0_1, %c0_2, %c0_3] : memref<1x4x256xf32, #tpu.memory_space<vmem>>, vector<1x4x256xf32>
    %2 = vector.shape_cast %1 : vector<1x4x256xf32> to vector<4x256xf32>
    %cst = arith.constant dense<0.000000e+00> : vector<8x256xf32>
    %3 = tpu.matmul %0, %2, %cst {dimension_numbers = #tpu.dot_dimension_numbers<[1], [0], [0], [1], [0, 0, 1, 1], [], []>} : vector<8x4xf32>, vector<4x256xf32>, vector<8x256xf32> -> vector<8x256xf32>
    %c0_4 = arith.constant 0 : index
    %c0_5 = arith.constant 0 : index
    %4 = vector.load %arg5[%c0_4, %c0_5] : memref<8x4xf32, #tpu.memory_space<vmem>>, vector<8x4xf32>
    %c0_6 = arith.constant 0 : index
    %c0_7 = arith.constant 0 : index
    %c0_8 = arith.constant 0 : index
    %5 = vector.load %arg3[%c0_6, %c0_7, %c0_8] : memref<1x4x256xf32, #tpu.memory_space<vmem>>, vector<1x4x256xf32>
    %6 = vector.shape_cast %5 : vector<1x4x256xf32> to vector<4x256xf32>
    %cst_9 = arith.constant dense<0.000000e+00> : vector<8x256xf32>
    %7 = tpu.matmul %4, %6, %cst_9 {dimension_numbers = #tpu.dot_dimension_numbers<[1], [0], [0], [1], [0, 0, 1, 1], [], []>} : vector<8x4xf32>, vector<4x256xf32>, vector<8x256xf32> -> vector<8x256xf32>
    %8 = arith.addf %3, %7 : vector<8x256xf32>
    %c0_10 = arith.constant 0 : index
    %c0_11 = arith.constant 0 : index
    %9 = vector.load %arg6[%c0_10, %c0_11] : memref<8x1xf32, #tpu.memory_space<vmem>>, vector<8x1xf32>
    %10 = vector.broadcast %9 : vector<8x1xf32> to vector<8x256xf32>
    %11 = arith.mulf %8, %10 : vector<8x256xf32>
    %c0_12 = arith.constant 0 : index
    %c0_13 = arith.constant 0 : index
    %12 = vector.load %arg7[%c0_12, %c0_13] : memref<8x1xf32, #tpu.memory_space<vmem>>, vector<8x1xf32>
    %13 = vector.broadcast %12 : vector<8x1xf32> to vector<8x256xf32>
    %14 = arith.addf %11, %13 : vector<8x256xf32>
    %cst_14 = arith.constant 0.000000e+00 : f32
    %15 = vector.broadcast %cst_14 : f32 to vector<8x256xf32>
    %16 = arith.cmpf oge, %14, %15 : vector<8x256xf32>
    %c0_15 = arith.constant 0 : index
    %c0_16 = arith.constant 0 : index
    %17 = vector.load %arg8[%c0_15, %c0_16] : memref<8x1xf32, #tpu.memory_space<vmem>>, vector<8x1xf32>
    %18 = vector.broadcast %17 : vector<8x1xf32> to vector<8x256xf32>
    %19 = arith.mulf %18, %14 : vector<8x256xf32>
    %20 = arith.select %16, %14, %19 : vector<8x256xi1>, vector<8x256xf32>
    %c0_17 = arith.constant 0 : index
    %c0_18 = arith.constant 0 : index
    %c0_19 = arith.constant 0 : index
    %21 = vector.load %arg9[%c0_17, %c0_18, %c0_19] : memref<1x8x256xf32, #tpu.memory_space<vmem>>, vector<1x8x256xf32>
    %22 = vector.shape_cast %21 : vector<1x8x256xf32> to vector<8x256xf32>
    %23 = vector.shape_cast %20 : vector<8x256xf32> to vector<1x8x256xf32>
    tpu.vector_store %arg9[%c0_17, %c0_18, %c0_19], %23 {strides = array<i32>} : memref<1x8x256xf32, #tpu.memory_space<vmem>>, vector<1x8x256xf32>,
    return
  }
  func.func @transform_0(%arg0: i32, %arg1: i32) -> (i32, i32, i32) {
    %c0_i32 = arith.constant 0 : i32
    %c0_i32_0 = arith.constant 0 : i32
    return %arg0, %c0_i32, %arg1 : i32, i32, i32
  }
  func.func @transform_1(%arg0: i32, %arg1: i32) -> (i32, i32, i32) {
    %c0_i32 = arith.constant 0 : i32
    %c0_i32_0 = arith.constant 0 : i32
    return %arg0, %c0_i32, %arg1 : i32, i32, i32
  }
  func.func @transform_2(%arg0: i32, %arg1: i32) -> (i32, i32) {
    %c0_i32 = arith.constant 0 : i32
    %c0_i32_0 = arith.constant 0 : i32
    %c0_i32_1 = arith.constant 0 : i32
    return %c0_i32, %c0_i32_0 : i32, i32
  }
  func.func @transform_3(%arg0: i32, %arg1: i32) -> (i32, i32) {
    %c0_i32 = arith.constant 0 : i32
    %c0_i32_0 = arith.constant 0 : i32
    %c0_i32_1 = arith.constant 0 : i32
    return %c0_i32, %c0_i32_0 : i32, i32
  }
  func.func @transform_4(%arg0: i32, %arg1: i32) -> (i32, i32) {
    %c0_i32 = arith.constant 0 : i32
    %c0_i32_0 = arith.constant 0 : i32
    %c0_i32_1 = arith.constant 0 : i32
    return %c0_i32, %c0_i32_0 : i32, i32
  }
  func.func @transform_5(%arg0: i32, %arg1: i32) -> (i32, i32) {
    %c0_i32 = arith.constant 0 : i32
    %c0_i32_0 = arith.constant 0 : i32
    %c0_i32_1 = arith.constant 0 : i32
    return %c0_i32, %c0_i32_0 : i32, i32
  }
  func.func @transform_6(%arg0: i32, %arg1: i32) -> (i32, i32) {
    %c0_i32 = arith.constant 0 : i32
    %c0_i32_0 = arith.constant 0 : i32
    %c0_i32_1 = arith.constant 0 : i32
    return %c0_i32, %c0_i32_0 : i32, i32
  }
  func.func @transform_7(%arg0: i32, %arg1: i32) -> (i32, i32, i32) {
    %c0_i32 = arith.constant 0 : i32
    %c0_i32_0 = arith.constant 0 : i32
    return %arg0, %c0_i32, %arg1 : i32, i32, i32
  }
}

module attributes {stable_mosaic.version = 11 : i64} {
  func.func @_stats_kernel(%arg0: i32, %arg1: i32, %arg2: memref<1x4x256xf32, #tpu.memory_space<vmem>>, %arg3: memref<1x4x256xf32, #tpu.memory_space<vmem>>, %arg4: memref<8x4xf32, #tpu.memory_space<vmem>>, %arg5: memref<8x4xf32, #tpu.memory_space<vmem>>, %arg6: memref<8x1xf32, #tpu.memory_space<vmem>>, %arg7: memref<8x1xf32, #tpu.memory_space<vmem>>) attributes {dimension_semantics = [#tpu.dimension_semantics<arbitrary>, #tpu.dimension_semantics<arbitrary>], iteration_bounds = array<i64: 2, 1>, scalar_prefetch = 0 : i64, scratch_operands = 0 : i64, tpu.core_type = #tpu.core_type<tc>, window_params = [{transform_indices = @transform_0, window_bounds = array<i64: 1, 4, 256>}, {transform_indices = @transform_1, window_bounds = array<i64: 1, 4, 256>}, {pipeline_mode = #tpu.pipeline_mode<synchronous>, transform_indices = @transform_2, window_bounds = array<i64: 8, 4>}, {pipeline_mode = #tpu.pipeline_mode<synchronous>, transform_indices = @transform_3, window_bounds = array<i64: 8, 4>}, {pipeline_mode = #tpu.pipeline_mode<synchronous>, transform_indices = @transform_4, window_bounds = array<i64: 8, 1>}, {pipeline_mode = #tpu.pipeline_mode<synchronous>, transform_indices = @transform_5, window_bounds = array<i64: 8, 1>}]} {
    %c0_i32 = arith.constant 0 : i32
    %0 = arith.cmpi eq, %arg0, %c0_i32 : i32
    %c0_i32_0 = arith.constant 0 : i32
    %1 = arith.cmpi eq, %arg1, %c0_i32_0 : i32
    %2 = arith.andi %0, %1 : i1
    %3 = arith.extui %2 : i1 to i32
    %c0_i32_1 = arith.constant 0 : i32
    %4 = arith.cmpi ne, %3, %c0_i32_1 : i32
    scf.if %4 {
      %cst_22 = arith.constant 0.000000e+00 : f32
      %25 = vector.broadcast %cst_22 : f32 to vector<8x1xf32>
      %c0_23 = arith.constant 0 : index
      %c0_24 = arith.constant 0 : index
      %26 = vector.load %arg6[%c0_23, %c0_24] : memref<8x1xf32, #tpu.memory_space<vmem>>, vector<8x1xf32>
      tpu.vector_store %arg6[%c0_23, %c0_24], %25 {strides = array<i32>} : memref<8x1xf32, #tpu.memory_space<vmem>>, vector<8x1xf32>,
      %cst_25 = arith.constant 0.000000e+00 : f32
      %27 = vector.broadcast %cst_25 : f32 to vector<8x1xf32>
      %c0_26 = arith.constant 0 : index
      %c0_27 = arith.constant 0 : index
      %28 = vector.load %arg7[%c0_26, %c0_27] : memref<8x1xf32, #tpu.memory_space<vmem>>, vector<8x1xf32>
      tpu.vector_store %arg7[%c0_26, %c0_27], %27 {strides = array<i32>} : memref<8x1xf32, #tpu.memory_space<vmem>>, vector<8x1xf32>,
    } else {
    }
    %c0 = arith.constant 0 : index
    %c0_2 = arith.constant 0 : index
    %5 = vector.load %arg4[%c0, %c0_2] : memref<8x4xf32, #tpu.memory_space<vmem>>, vector<8x4xf32>
    %c0_3 = arith.constant 0 : index
    %c0_4 = arith.constant 0 : index
    %c0_5 = arith.constant 0 : index
    %6 = vector.load %arg2[%c0_3, %c0_4, %c0_5] : memref<1x4x256xf32, #tpu.memory_space<vmem>>, vector<1x4x256xf32>
    %7 = vector.shape_cast %6 : vector<1x4x256xf32> to vector<4x256xf32>
    %cst = arith.constant dense<0.000000e+00> : vector<8x256xf32>
    %8 = tpu.matmul %5, %7, %cst {dimension_numbers = #tpu.dot_dimension_numbers<[1], [0], [0], [1], [0, 0, 1, 1], [], []>} : vector<8x4xf32>, vector<4x256xf32>, vector<8x256xf32> -> vector<8x256xf32>
    %c0_6 = arith.constant 0 : index
    %c0_7 = arith.constant 0 : index
    %9 = vector.load %arg5[%c0_6, %c0_7] : memref<8x4xf32, #tpu.memory_space<vmem>>, vector<8x4xf32>
    %c0_8 = arith.constant 0 : index
    %c0_9 = arith.constant 0 : index
    %c0_10 = arith.constant 0 : index
    %10 = vector.load %arg3[%c0_8, %c0_9, %c0_10] : memref<1x4x256xf32, #tpu.memory_space<vmem>>, vector<1x4x256xf32>
    %11 = vector.shape_cast %10 : vector<1x4x256xf32> to vector<4x256xf32>
    %cst_11 = arith.constant dense<0.000000e+00> : vector<8x256xf32>
    %12 = tpu.matmul %9, %11, %cst_11 {dimension_numbers = #tpu.dot_dimension_numbers<[1], [0], [0], [1], [0, 0, 1, 1], [], []>} : vector<8x4xf32>, vector<4x256xf32>, vector<8x256xf32> -> vector<8x256xf32>
    %13 = arith.addf %8, %12 : vector<8x256xf32>
    %c0_12 = arith.constant 0 : index
    %c0_13 = arith.constant 0 : index
    %14 = vector.load %arg6[%c0_12, %c0_13] : memref<8x1xf32, #tpu.memory_space<vmem>>, vector<8x1xf32>
    %cst_14 = arith.constant dense<0.000000e+00> : vector<8xf32>
    %15 = vector.multi_reduction <add>, %13, %cst_14 [1] : vector<8x256xf32> to vector<8xf32>
    %16 = vector.shape_cast %15 : vector<8xf32> to vector<8x1xf32>
    %17 = arith.addf %14, %16 : vector<8x1xf32>
    %c0_15 = arith.constant 0 : index
    %c0_16 = arith.constant 0 : index
    %18 = vector.load %arg6[%c0_15, %c0_16] : memref<8x1xf32, #tpu.memory_space<vmem>>, vector<8x1xf32>
    tpu.vector_store %arg6[%c0_15, %c0_16], %17 {strides = array<i32>} : memref<8x1xf32, #tpu.memory_space<vmem>>, vector<8x1xf32>,
    %c0_17 = arith.constant 0 : index
    %c0_18 = arith.constant 0 : index
    %19 = vector.load %arg7[%c0_17, %c0_18] : memref<8x1xf32, #tpu.memory_space<vmem>>, vector<8x1xf32>
    %20 = arith.mulf %13, %13 : vector<8x256xf32>
    %cst_19 = arith.constant dense<0.000000e+00> : vector<8xf32>
    %21 = vector.multi_reduction <add>, %20, %cst_19 [1] : vector<8x256xf32> to vector<8xf32>
    %22 = vector.shape_cast %21 : vector<8xf32> to vector<8x1xf32>
    %23 = arith.addf %19, %22 : vector<8x1xf32>
    %c0_20 = arith.constant 0 : index
    %c0_21 = arith.constant 0 : index
    %24 = vector.load %arg7[%c0_20, %c0_21] : memref<8x1xf32, #tpu.memory_space<vmem>>, vector<8x1xf32>
    tpu.vector_store %arg7[%c0_20, %c0_21], %23 {strides = array<i32>} : memref<8x1xf32, #tpu.memory_space<vmem>>, vector<8x1xf32>,
    return
  }
  func.func @transform_0(%arg0: i32, %arg1: i32) -> (i32, i32, i32) {
    %c0_i32 = arith.constant 0 : i32
    %c0_i32_0 = arith.constant 0 : i32
    return %arg0, %c0_i32, %arg1 : i32, i32, i32
  }
  func.func @transform_1(%arg0: i32, %arg1: i32) -> (i32, i32, i32) {
    %c0_i32 = arith.constant 0 : i32
    %c0_i32_0 = arith.constant 0 : i32
    return %arg0, %c0_i32, %arg1 : i32, i32, i32
  }
  func.func @transform_2(%arg0: i32, %arg1: i32) -> (i32, i32) {
    %c0_i32 = arith.constant 0 : i32
    %c0_i32_0 = arith.constant 0 : i32
    %c0_i32_1 = arith.constant 0 : i32
    return %c0_i32, %c0_i32_0 : i32, i32
  }
  func.func @transform_3(%arg0: i32, %arg1: i32) -> (i32, i32) {
    %c0_i32 = arith.constant 0 : i32
    %c0_i32_0 = arith.constant 0 : i32
    %c0_i32_1 = arith.constant 0 : i32
    return %c0_i32, %c0_i32_0 : i32, i32
  }
  func.func @transform_4(%arg0: i32, %arg1: i32) -> (i32, i32) {
    %c0_i32 = arith.constant 0 : i32
    %c0_i32_0 = arith.constant 0 : i32
    %c0_i32_1 = arith.constant 0 : i32
    return %c0_i32, %c0_i32_0 : i32, i32
  }
  func.func @transform_5(%arg0: i32, %arg1: i32) -> (i32, i32) {
    %c0_i32 = arith.constant 0 : i32
    %c0_i32_0 = arith.constant 0 : i32
    %c0_i32_1 = arith.constant 0 : i32
    return %c0_i32, %c0_i32_0 : i32, i32
  }
}

</mosaic_0001>

<bundles_post_ra>
// kernel: cat_conv2d.3
= control target key start
LH: loop header
LB: loop body
LE: loop exit
PB: predicated region body
PF: predicated region fallthrough
CT: control target
= control target key end

     0   :  { %s775_s24 = smov 0   ;;  %s777_s25 = smov 0   ;;  %s830_s0 = inlined_call_operand.vmem [shape: f32[2,4,256], index: 0, kind: input, shape index: {}]   ;;  %s831_s1 = inlined_call_operand.vmem [shape: f32[2,4,256], index: 1, kind: input, shape index: {}]   ;;  %s832_s2 = inlined_call_operand.vmem [shape: f32[8,4], index: 2, kind: input, shape index: {}]   ;;  %s833_s3 = inlined_call_operand.vmem [shape: f32[8,4], index: 3, kind: input, shape index: {}]   ;;  %s834_s4 = inlined_call_operand.vmem [shape: f32[8,1], index: 4, kind: input, shape index: {}]   ;;  %s835_s5 = inlined_call_operand.vmem [shape: f32[8,1], index: 5, kind: input, shape index: {}]   ;;  %s836_s6 = inlined_call_operand.vmem [shape: f32[8,1], index: 6, kind: input, shape index: {}]   ;;  %s837_s7 = inlined_call_operand.vmem [shape: f32[2,8,256], index: 7, kind: output, shape index: {}]  }
   0x1   :  { %s779_s26 = smov 0  }
   0x2 LB: > { %s29_s27 = sadd.s32 1, %s727_s25  ;;  %p659_p0 = scmp.ge.s32.totalorder %s731_s26, 1  ;;  %s731_s26 = sphi %s779_s26, %s17_s26   ;;  %s727_s25 = sphi %s777_s25, %s839_s25   ;;  %s723_s24 = sphi %s775_s24, %s838_s24  }
   0x3   : > { %p31_p1 = scmp.ge.s32.totalorder %s29_s27, 2  ;;  %p275_p2 = scmp.lt.s32.totalorder %s731_s26, 3 }
   0x5   : > { %s841_s27 = smov (%p31_p1, %s29_s27), 0  ;;  %p276_p3 = pnand %p659_p0, %p275_p2 }
   0x6   : > { %p325_p4 = scmp.lt.s32.totalorder (!%p276_p3), %s723_s24, 1  ;;  %v733_v0 = vmov (!%p276_p3), 0.0   ;;  %v520_v1 = vld [vmem:[%s834_s4] sm:$0xff] (!%p276_p3)  ;;  %v734_v3 = vmov (!%p276_p3), 0   ;;  %vm364_vm0 = vcmask (!%p276_p3), 1043456   ;;  %vm360_vm1 = vcmask (!%p276_p3), 31744  }
   0x7   : > { %279 = sbr.rel (%p276_p3) target bundleno = 246 (0xf6), region = 48  ;;  %433 = vmatprep.mubr.f32.mxu1 (!%p276_p3), %v733_v0  ;;  %513 = vmatprep.mubr.f32.mxu0 (!%p276_p3), %v733_v0  ;;  %v538_v2 = vld [vmem:[%s836_s6] sm:$0xff] (!%p276_p3) }
   0x8   : > { %705 = vset.pattern.permute.xlu0 (!%p276_p3), %v734_v3  ;;  %706 = vset.pattern.permute.xlu1 (!%p276_p3), %v734_v3  ;;  %v528_v4 = vld [vmem:[%s835_s5] sm:$0xff] (!%p276_p3) }
   0x9   : > { %523 = vperm.xlu0 (!%p276_p3), %705, %v520_v1   ;;  %541 = vperm.xlu1 (!%p276_p3), %706, %v538_v2   ;;  %v356_v9 = vld [vmem:[%s833_s3] sm:$0xff] (!%p276_p3) }
   0xa   : > { %v354_v10 = vld [vmem:[%s832_s2] sm:$0xff] (!%p276_p3) }
   0xd   : > { %531 = vperm.xlu0 (!%p276_p3), %705, %v528_v4  }
   0xe   : > { %s843_s24 = smov (!%p325_p4, %s723_s24), 1 }
   0xf   : > { %s674_s9 = sshll.u32 %s843_s24, 3  ;;  %s676_s22 = sshll.u32 %s843_s24, 4 }
  0x10   : > { %s342_s14 = scalar_lea.vmem %s831_s1, %s674_s9  ;;  %s332_s17 = scalar_lea.vmem %s830_s0, %s674_s9 }
  0x11   : > { %v357_v5 = vld [vmem:[%s342_s14] sm:$0xff]  ;;  %s352_s29 = scalar_lea.vmem %s837_s7, %s676_s22 }
  0x12   : > { %v355_v6 = vld [vmem:[%s332_s17] sm:$0xff]  ;;  %v359_v7 = vcombine.high %v357_v5, %v357_v5 }
  0x13   : > { %v441_v8 = vcombine.high %v355_v6, %v355_v6 }
  0x14   : > { %666 = vmatprep.subr.msk.mxu1 %vm364_vm0, %v359_v7 }
  0x15   : > { %669 = vmatprep.subr.msk.mxu0 %vm364_vm0, %v441_v8  ;;  %667 = vmatpush1.msk.msra.mxu1 %vm364_vm0, %v357_v5 }
  0x16   : > { %670 = vmatpush1.msk.msra.mxu0 %vm364_vm0, %v355_v6  ;;  %668 = vmatmul.mubr.msk.f32.vlgmr.msra.gmra.mrb[0].mxu1 %vm360_vm1, %v356_v9 }
  0x17   : > { %671 = vmatmul.mubr.msk.f32.vlgmr.msra.gmra.mrb[0].mxu0 %vm360_vm1, %v354_v10 }
  0x88   : > { %v524_v11 = vpop.permute.xlu0 %523  ;;  %v542_v21 = vpop.permute.xlu1 %541 }
  0x8c   : > { %v532_v19 = vpop.permute.xlu0 %531 }
  0xe9   : > { %v435_v12 = vpop.f32.mrb[0].mxu1 }
  0xea   : > { %v515_v13 = vpop.f32.mrb[0].mxu0  ;;  %v437_v15 = vpop.f32.mrb[1].mxu1 }
  0xeb   : > { %v516_v14 = vadd.f32 %v515_v13, %v435_v12  ;;  %v517_v16 = vpop.f32.mrb[1].mxu0 }
  0xec   : > { %v518_v17 = vadd.f32 %v517_v16, %v437_v15 }
  0xed   : > { %v526_v18 = vmul.f32 %v524_v11, %v516_v14 }
  0xee   : > { %v527_v20 = vmul.f32 %v524_v11, %v518_v17 }
  0xef   : > { %v534_v22 = vadd.f32 %v532_v19, %v526_v18 }
  0xf0   : > { %v535_v23 = vadd.f32 %v532_v19, %v527_v20 }
  0xf1   : > { %vm536_vm2 = vcmp.ge.f32.partialorder %v534_v22, 0.0  ;;  %v544_v24 = vmul.f32 %v542_v21, %v534_v22 }
  0xf2   : > { %vm537_vm3 = vcmp.ge.f32.partialorder %v535_v23, 0.0  ;;  %v545_v25 = vmul.f32 %v542_v21, %v535_v23 }
  0xf3   : > { %v546_v26 = vsel %vm536_vm2, %v534_v22, %v544_v24 }
  0xf4   : > { %v547_v27 = vsel %vm537_vm3, %v535_v23, %v545_v25  ;;  %548 = vst [vmem:[%s352_s29] sm:$0xff] %v546_v26 }
  0xf5   : > { %549 = vst [vmem:[%s352_s29 + $0x8] sm:$0xff] %v547_v27 }
  0xf6 PF: > { %s17_s26 = sadd.s32 1, %s731_s26   ;;  %s838_s24 = smov %s727_s25 }
  0xf7   : > { %p14_p5 = scmp.ge.s32.totalorder %s17_s26, 4   ;;  %s839_s25 = smov %s841_s27 }
  0xf9   :  { %16 = sbr.rel (!%p14_p5) target bundleno = 2 (0x2), region = 81 }

// kernel: cat_conv2d.2
= control target key start
LH: loop header
LB: loop body
LE: loop exit
PB: predicated region body
PF: predicated region fallthrough
CT: control target
= control target key end

     0   :  { %s634_s18 = smov 0   ;;  %s636_s19 = smov 0   ;;  %s691_s0 = inlined_call_operand.vmem [shape: f32[2,4,256], index: 0, kind: input, shape index: {}]   ;;  %s692_s1 = inlined_call_operand.vmem [shape: f32[2,4,256], index: 1, kind: input, shape index: {}]   ;;  %s693_s2 = inlined_call_operand.vmem [shape: f32[8,4], index: 2, kind: input, shape index: {}]   ;;  %s694_s3 = inlined_call_operand.vmem [shape: f32[8,4], index: 3, kind: input, shape index: {}]   ;;  %s695_s4 = inlined_call_operand.vmem [shape: f32[8,1], index: 4, kind: output, shape index: {0}]   ;;  %s696_s5 = inlined_call_operand.vmem [shape: f32[8,1], index: 5, kind: output, shape index: {1}]  }
   0x1   :  { %s638_s20 = smov 0  }
   0x2 LB: > { %s28_s21 = sadd.s32 1, %s596_s19  ;;  %p531_p0 = scmp.ge.s32.totalorder %s600_s20, 1  ;;  %s600_s20 = sphi %s638_s20, %s16_s20   ;;  %s596_s19 = sphi %s636_s19, %s698_s19   ;;  %s592_s18 = sphi %s634_s18, %s697_s18  }
   0x3   : > { %p30_p1 = scmp.ge.s32.totalorder %s28_s21, 2  ;;  %p216_p2 = scmp.lt.s32.totalorder %s600_s20, 3 }
   0x5   : > { %s700_s21 = smov (%p30_p1, %s28_s21), 0  ;;  %p217_p3 = pnand %p531_p0, %p216_p2 }
   0x6   : > { %p253_p4 = scmp.lt.s32.totalorder (!%p217_p3), %s592_s18, 1  ;;  %p272_p5 = scmp.eq.s32.totalorder (!%p217_p3), %s592_s18, 0 }
   0x7   : > { %220 = sbr.rel (%p217_p3) target bundleno = 393 (0x189), region = 36 }
   0xe   : > { %s702_s18 = smov (!%p253_p4, %s592_s18), 1  ;;  %277 = sbr.rel (!%p272_p5) target bundleno = 21 (0x15), region = 40 }
   0xf   : > { %s545_s22 = sshll.u32 %s702_s18, 3  ;;  %vm278_vm0 = vcmask (%p272_p5), 7168   ;;  %v602_v0 = vmov (%p272_p5), 0.0  }
  0x10   : > { %s260_s25 = scalar_lea.vmem %s691_s0, %s545_s22  ;;  %s270_s28 = scalar_lea.vmem %s692_s1, %s545_s22  ;;  %279 = vst.msk [vmem:[%s695_s4] sm:$0xff] (%p272_p5), %vm278_vm0, %v602_v0  ;;  %280 = vst.msk [vmem:[%s696_s5] sm:$0xff] (%p272_p5), %vm278_vm0, %v602_v0 }
  0x15 PF: > { %v284_v1 = vld [vmem:[%s270_s28] sm:$0xff]  ;;  %vm291_vm1 = vcmask 1043456   ;;  %v603_v5 = vmov 0.0   ;;  %vm287_vm2 = vcmask 31744   ;;  %vm452_vm3 = vcmask 7168  }
  0x16   : > { %v282_v2 = vld [vmem:[%s260_s25] sm:$0xff]  ;;  %v286_v3 = vcombine.high %v284_v1, %v284_v1  ;;  %360 = vmatprep.mubr.f32.mxu1 %v603_v5  ;;  %440 = vmatprep.mubr.f32.mxu0 %v603_v5 }
  0x17   : > { %v368_v4 = vcombine.high %v282_v2, %v282_v2  ;;  %v283_v6 = vld [vmem:[%s694_s3] sm:$0xff] }
  0x18   : > { %v281_v7 = vld [vmem:[%s693_s2] sm:$0xff]  ;;  %537 = vmatprep.subr.msk.mxu1 %vm291_vm1, %v286_v3 }
  0x19   : > { %540 = vmatprep.subr.msk.mxu0 %vm291_vm1, %v368_v4  ;;  %538 = vmatpush1.msk.msra.mxu1 %vm291_vm1, %v284_v1  ;;  %v447_v18 = vld [vmem:[%s695_s4] sm:$0xff] }
  0x1a   : > { %541 = vmatpush1.msk.msra.mxu0 %vm291_vm1, %v282_v2  ;;  %539 = vmatmul.mubr.msk.f32.vlgmr.msra.gmra.mrb[0].mxu1 %vm287_vm2, %v283_v6  ;;  %v454_v21 = vld [vmem:[%s696_s5] sm:$0xff] }
  0x1b   : > { %542 = vmatmul.mubr.msk.f32.vlgmr.msra.gmra.mrb[0].mxu0 %vm287_vm2, %v281_v7 }
  0xed   : > { %v362_v8 = vpop.f32.mrb[0].mxu1 }
  0xee   : > { %v442_v9 = vpop.f32.mrb[0].mxu0  ;;  %v364_v11 = vpop.f32.mrb[1].mxu1 }
  0xef   : > { %v443_v10 = vadd.f32 %v442_v9, %v362_v8  ;;  %v444_v12 = vpop.f32.mrb[1].mxu0 }
  0xf0   : > { %v445_v13 = vadd.f32 %v444_v12, %v364_v11 }
  0xf1   : > { %v455_v14 = vmul.f32 %v443_v10, %v443_v10 }
  0xf2   : > { %v456_v15 = vmul.f32 %v445_v13, %v445_v13  ;;  %v448_v16 = vadd.f32 %v445_v13, %v443_v10 }
  0xf4   : > { %449 = vadd.xlane.f32.xlu0 %v448_v16  ;;  %v457_v17 = vadd.f32 %v456_v15, %v455_v14 }
  0xf8   : > { %458 = vadd.xlane.f32.xlu0 %v457_v17 }
 0x181   : > { %v450_v19 = vpop.xlane.xlu0 %449 }
 0x182   : > { %v451_v20 = vadd.f32 %v450_v19, %v447_v18 }
 0x184   : > { %453 = vst.msk [vmem:[%s695_s4] sm:$0xff] %vm452_vm3, %v451_v20 }
 0x185   : > { %v459_v22 = vpop.xlane.xlu0 %458 }
 0x186   : > { %v460_v23 = vadd.f32 %v459_v22, %v454_v21 }
 0x188   : > { %461 = vst.msk [vmem:[%s696_s5] sm:$0xff] %vm452_vm3, %v460_v23 }
 0x189 PF: > { %s16_s20 = sadd.s32 1, %s600_s20   ;;  %s697_s18 = smov %s596_s19 }
 0x18a   : > { %p13_p6 = scmp.ge.s32.totalorder %s16_s20, 4   ;;  %s698_s19 = smov %s700_s21 }
 0x18c   :  { %15 = sbr.rel (!%p13_p6) target bundleno = 2 (0x2), region = 77 }

</bundles_post_ra>
